<compile_context>
chip_gen: v7x
topology: tpu7x:2x2x1
jax: 0.10.0
libtpu: 0.0.40
codegen_flags: <defaults>
</compile_context>

<pallas_src>
import numpy as np
import jax
import jax.numpy as jnp
from jax.experimental import pallas as pl
from jax.experimental.pallas import tpu as pltpu

HIDDEN = 32        # hidden size of the splitter MLP
NUM_FEATURES = 16  # total number of input features
SUBSET_SIZE = 8    # |features[id]| — every node's feature subset size
NUM_INPUTS = 8     # batch of samples fed through the tree
DEPTH = 2          # tree depth -> 3 internal nodes, 4 leaves
N_NODES = 3        # internal nodes in construction order: root, left, right
FUSED = N_NODES * HIDDEN   # 96 — fused hidden width across the 3 nodes

# Each node's feature subset is a contiguous range (static block placement).
SUBSET_STARTS = (0, 2, 4)   # node 0: [0:8], node 1: [2:10], node 2: [4:12]

# Row layout of the single packed parameter buffer (all offsets sublane-aligned).
ROW_W1 = 0                     # (16, 96)  fused first-layer weights
ROW_B1 = ROW_W1 + NUM_FEATURES # (1, 96)   fused first-layer bias
ROW_W2 = 24                    # (96, 96)  block-diagonal second-layer weights
ROW_B2 = ROW_W2 + FUSED        # (1, 96)
ROW_W3 = 128                   # (96, 96)  cols 0:3 hold W3[:,0]-W3[:,1] per node
ROW_B3 = ROW_W3 + FUSED        # (1, 96)   cols 0:3 hold b3[0]-b3[1] per node
PACK_ROWS = 232                # padded to a multiple of 8 sublanes


def tree_forward_kernel(x_ref, pack_ref, leaf_ref, out_ref):
    """Entire depth-2 tree forward in one kernel invocation.

    x_ref:    (N, F)          VMEM
    pack_ref: (PACK_ROWS, 96) VMEM — all fused weights/biases (see ROW_* layout)
    leaf_ref: (4,)            SMEM leaf constants [LL, LR, RL, RR]
    out_ref:  (N, 4)          VMEM — cols 0:3 = p0 of every internal node,
                                      col 3   = routed leaf prediction
    """
    x = x_ref[...]                                             # (N, F)

    w1 = pack_ref[ROW_W1:ROW_W1 + NUM_FEATURES, :]             # (16, 96)
    b1 = pack_ref[ROW_B1:ROW_B1 + 1, :]                        # (1, 96)
    w2 = pack_ref[ROW_W2:ROW_W2 + FUSED, :]                    # (96, 96)
    b2 = pack_ref[ROW_B2:ROW_B2 + 1, :]                        # (1, 96)
    w3 = pack_ref[ROW_W3:ROW_W3 + FUSED, :]                    # (96, 96)
    b3 = pack_ref[ROW_B3:ROW_B3 + 1, :]                        # (1, 96)

    # Fused splitter MLPs: 3 dense matmuls instead of 9 lane-sparse ones.
    h1 = jnp.tanh(jnp.dot(x, w1, preferred_element_type=jnp.float32) + b1)
    h2 = jnp.tanh(jnp.dot(h1, w2, preferred_element_type=jnp.float32) + b2)
    z = jnp.dot(h2, w3, preferred_element_type=jnp.float32) + b3      # (N, 96)
    zd = z[:, 0:N_NODES]                                       # (N, 3) logits z0-z1

    # Routing on the logit sign: sigmoid(zd) >= 0.5  <=>  zd >= 0
    # (matches PyTorch's `splits[:, 0] >= 0.5` in exact arithmetic; can differ
    #  by one ULP only when z0 ~= z1).
    go_left = zd >= 0.0
    ll = leaf_ref[0]   # left.left
    lr = leaf_ref[1]   # left.right
    rl = leaf_ref[2]   # right.left
    rr = leaf_ref[3]   # right.right
    y = jnp.where(go_left[:, 0:1],
                  jnp.where(go_left[:, 1:2], ll, lr),
                  jnp.where(go_left[:, 2:3], rl, rr))          # (N, 1)

    # y store does not depend on the sigmoids; write columns directly
    # (no cross-lane concatenate).
    out_ref[:, N_NODES:N_NODES + 1] = y
    out_ref[:, 0:N_NODES] = jax.nn.sigmoid(zd)                 # p0 == softmax[:, 0]


@jax.jit
def tree_forward(x, w_pack, leaf_best):
    """Single-dispatch forward of the whole tree. Returns (p0 per node, y_pred)."""
    n = x.shape[0]
    out = pl.pallas_call(
        tree_forward_kernel,
        out_shape=jax.ShapeDtypeStruct((n, N_NODES + 1), jnp.float32),
        in_specs=[
            pl.BlockSpec(memory_space=pltpu.MemorySpace.VMEM),   # x
            pl.BlockSpec(memory_space=pltpu.MemorySpace.VMEM),   # packed params
            pl.BlockSpec(memory_space=pltpu.MemorySpace.SMEM),   # leaf constants
        ],
        out_specs=pl.BlockSpec(memory_space=pltpu.MemorySpace.VMEM),
    )(x, w_pack, leaf_best)
    return out[:, :N_NODES], out[:, N_NODES]


def init_linear(key, fan_in, fan_out):
    """Deterministic PyTorch-style nn.Linear init: U(-1/sqrt(fan_in), 1/sqrt(fan_in))."""
    k = 1.0 / np.sqrt(fan_in)
    kw, kb = jax.random.split(key)
    w = jax.random.uniform(kw, (fan_in, fan_out), jnp.float32, -k, k)
    b = jax.random.uniform(kb, (1, fan_out), jnp.float32, -k, k)
    return w, b


def pack_params(w1s, b1s, w2s, b2s, w3s, b3s):
    """Host-side packing of all splitter params into one flat (232, 96) buffer."""
    pack = np.zeros((PACK_ROWS, FUSED), dtype=np.float32)
    for i in range(N_NODES):
        c = i * HIDDEN
        s = SUBSET_STARTS[i]
        pack[ROW_W1 + s:ROW_W1 + s + SUBSET_SIZE, c:c + HIDDEN] = np.asarray(w1s[i])
        pack[ROW_B1, c:c + HIDDEN] = np.asarray(b1s[i])[0]
        pack[ROW_W2 + c:ROW_W2 + c + HIDDEN, c:c + HIDDEN] = np.asarray(w2s[i])
        pack[ROW_B2, c:c + HIDDEN] = np.asarray(b2s[i])[0]
        w3 = np.asarray(w3s[i])
        b3 = np.asarray(b3s[i])
        pack[ROW_W3 + c:ROW_W3 + c + HIDDEN, i] = w3[:, 0] - w3[:, 1]
        pack[ROW_B3, i] = b3[0, 0] - b3[0, 1]
    return jnp.asarray(pack)


def ref_splitter(xsub, w1, b1, w2, b2, w3, b3):
    """Pure-JAX reference: the original full-softmax splitter."""
    hp = jax.lax.Precision.HIGHEST
    h1 = jnp.tanh(jnp.dot(xsub, w1, precision=hp) + b1)
    h2 = jnp.tanh(jnp.dot(h1, w2, precision=hp) + b2)
    return jax.nn.softmax(jnp.dot(h2, w3, precision=hp) + b3, axis=-1)


if __name__ == "__main__":
    key = jax.random.PRNGKey(0)
    key, kx = jax.random.split(key)
    x = jax.random.normal(kx, (NUM_INPUTS, NUM_FEATURES), dtype=jnp.float32)

    # `features` dict as in the PyTorch constructor (indexed by node id / depth);
    # all subsets have the same length so splitter input dims match.
    node_subsets = [np.arange(s, s + SUBSET_SIZE) for s in SUBSET_STARTS]

    # Per-node splitter parameters.
    w1s, b1s, w2s, b2s, w3s, b3s = [], [], [], [], [], []
    for _ in range(N_NODES):
        key, k1, k2, k3 = jax.random.split(key, 4)
        w1, b1 = init_linear(k1, SUBSET_SIZE, HIDDEN)
        w2, b2 = init_linear(k2, HIDDEN, HIDDEN)
        w3, b3 = init_linear(k3, HIDDEN, 2)
        w1s.append(w1); b1s.append(b1)
        w2s.append(w2); b2s.append(b2)
        w3s.append(w3); b3s.append(b3)

    # Single packed parameter buffer (block-structured fused weights + biases,
    # softmax -> sigmoid(z0 - z1) difference weights precomputed on host).
    W_pack = pack_params(w1s, b1s, w2s, b2s, w3s, b3s)          # (232, 96)

    # Leaf "best" predictors (normally set by populate_best); deterministic here.
    # Order: left.left, left.right, right.left, right.right
    leaf_best = jnp.array([0.0, 1.0, 2.0, 3.0], dtype=jnp.float32)
    # TODO(synk): populate_best / loss / shap-based compute_importance are
    # training/analysis helpers (mode, cross-entropy, SHAP) and are not part of
    # the forward pass implemented here.

    # Single-dispatch fused forward.
    p0, y_pred = tree_forward(x, W_pack, leaf_best)
    p0 = jax.block_until_ready(p0)
    y_pred = jax.block_until_ready(y_pred)

    # Pure-JAX reference: original per-node softmax splitters + routing.
    ref_p = jnp.stack([
        ref_splitter(x[:, node_subsets[i]], w1s[i], b1s[i],
                     w2s[i], b2s[i], w3s[i], b3s[i])
        for i in range(N_NODES)
    ])                                              # (3, N, 2)
    ref_p0 = jnp.transpose(ref_p[:, :, 0])          # (N, 3)
    ref_left = ref_p[:, :, 0] >= 0.5                # (3, N)
    ref_y = jnp.where(
        ref_left[0],
        jnp.where(ref_left[1], leaf_best[0], leaf_best[1]),
        jnp.where(ref_left[2], leaf_best[2], leaf_best[3]),
    ).astype(jnp.float32)

    # sigmoid(z0-z1) vs softmax[:,0] are identical up to float rounding.
    np.testing.assert_allclose(np.asarray(p0), np.asarray(ref_p0),
                               rtol=1e-5, atol=1e-5)
    np.testing.assert_array_equal(np.asarray(y_pred), np.asarray(ref_y))
    assert y_pred.shape == (NUM_INPUTS,)

    print("KERNEL_OK")
</pallas_src>

<mosaic_0001>
module attributes {stable_mosaic.version = 11 : i64} {
  func.func @tree_forward_kernel(%arg0: memref<8x16xf32, #tpu.memory_space<vmem>>, %arg1: memref<232x96xf32, #tpu.memory_space<vmem>>, %arg2: memref<4xf32, #tpu.memory_space<smem>>, %arg3: memref<8x4xf32, #tpu.memory_space<vmem>>) attributes {dimension_semantics = [], scalar_prefetch = 0 : i64, scratch_operands = 0 : i64, tpu.core_type = #tpu.core_type<tc>} {
    %c0 = arith.constant 0 : index
    %c0_0 = arith.constant 0 : index
    %0 = vector.load %arg0[%c0, %c0_0] : memref<8x16xf32, #tpu.memory_space<vmem>>, vector<8x16xf32>
    %c0_1 = arith.constant 0 : index
    %c0_2 = arith.constant 0 : index
    %1 = vector.load %arg1[%c0_1, %c0_2] : memref<232x96xf32, #tpu.memory_space<vmem>>, vector<16x96xf32>
    %c16 = arith.constant 16 : index
    %c0_3 = arith.constant 0 : index
    %2 = vector.load %arg1[%c16, %c0_3] : memref<232x96xf32, #tpu.memory_space<vmem>>, vector<1x96xf32>
    %c24 = arith.constant 24 : index
    %c0_4 = arith.constant 0 : index
    %3 = vector.load %arg1[%c24, %c0_4] : memref<232x96xf32, #tpu.memory_space<vmem>>, vector<96x96xf32>
    %c120 = arith.constant 120 : index
    %c0_5 = arith.constant 0 : index
    %4 = vector.load %arg1[%c120, %c0_5] : memref<232x96xf32, #tpu.memory_space<vmem>>, vector<1x96xf32>
    %c128 = arith.constant 128 : index
    %c0_6 = arith.constant 0 : index
    %5 = vector.load %arg1[%c128, %c0_6] : memref<232x96xf32, #tpu.memory_space<vmem>>, vector<96x96xf32>
    %c224 = arith.constant 224 : index
    %c0_7 = arith.constant 0 : index
    %6 = vector.load %arg1[%c224, %c0_7] : memref<232x96xf32, #tpu.memory_space<vmem>>, vector<1x96xf32>
    %cst = arith.constant dense<0.000000e+00> : vector<8x96xf32>
    %7 = tpu.matmul %0, %1, %cst {dimension_numbers = #tpu.dot_dimension_numbers<[1], [0], [0], [1], [0, 0, 1, 1], [], []>} : vector<8x16xf32>, vector<16x96xf32>, vector<8x96xf32> -> vector<8x96xf32>
    %8 = vector.broadcast %2 : vector<1x96xf32> to vector<8x96xf32>
    %9 = arith.addf %7, %8 : vector<8x96xf32>
    %10 = math.tanh %9 : vector<8x96xf32>
    %cst_8 = arith.constant dense<0.000000e+00> : vector<8x96xf32>
    %11 = tpu.matmul %10, %3, %cst_8 {dimension_numbers = #tpu.dot_dimension_numbers<[1], [0], [0], [1], [0, 0, 1, 1], [], []>} : vector<8x96xf32>, vector<96x96xf32>, vector<8x96xf32> -> vector<8x96xf32>
    %12 = vector.broadcast %4 : vector<1x96xf32> to vector<8x96xf32>
    %13 = arith.addf %11, %12 : vector<8x96xf32>
    %14 = math.tanh %13 : vector<8x96xf32>
    %cst_9 = arith.constant dense<0.000000e+00> : vector<8x96xf32>
    %15 = tpu.matmul %14, %5, %cst_9 {dimension_numbers = #tpu.dot_dimension_numbers<[1], [0], [0], [1], [0, 0, 1, 1], [], []>} : vector<8x96xf32>, vector<96x96xf32>, vector<8x96xf32> -> vector<8x96xf32>
    %16 = vector.broadcast %6 : vector<1x96xf32> to vector<8x96xf32>
    %17 = arith.addf %15, %16 : vector<8x96xf32>
    %18 = vector.extract_strided_slice %17 {offsets = [0, 0], sizes = [8, 3], strides = [1, 1]} : vector<8x96xf32> to vector<8x3xf32>
    %cst_10 = arith.constant 0.000000e+00 : f32
    %19 = vector.broadcast %cst_10 : f32 to vector<8x3xf32>
    %20 = arith.cmpf oge, %18, %19 : vector<8x3xf32>
    %c0_11 = arith.constant 0 : index
    %21 = memref.load %arg2[%c0_11] : memref<4xf32, #tpu.memory_space<smem>>
    %c1 = arith.constant 1 : index
    %22 = memref.load %arg2[%c1] : memref<4xf32, #tpu.memory_space<smem>>
    %c2 = arith.constant 2 : index
    %23 = memref.load %arg2[%c2] : memref<4xf32, #tpu.memory_space<smem>>
    %c3 = arith.constant 3 : index
    %24 = memref.load %arg2[%c3] : memref<4xf32, #tpu.memory_space<smem>>
    %25 = vector.extract_strided_slice %20 {offsets = [0, 0], sizes = [8, 1], strides = [1, 1]} : vector<8x3xi1> to vector<8x1xi1>
    %26 = vector.extract_strided_slice %20 {offsets = [0, 1], sizes = [8, 1], strides = [1, 1]} : vector<8x3xi1> to vector<8x1xi1>
    %27 = vector.broadcast %21 : f32 to vector<8x1xf32>
    %28 = vector.broadcast %22 : f32 to vector<8x1xf32>
    %29 = arith.select %26, %27, %28 : vector<8x1xi1>, vector<8x1xf32>
    %30 = vector.extract_strided_slice %20 {offsets = [0, 2], sizes = [8, 1], strides = [1, 1]} : vector<8x3xi1> to vector<8x1xi1>
    %31 = vector.broadcast %23 : f32 to vector<8x1xf32>
    %32 = vector.broadcast %24 : f32 to vector<8x1xf32>
    %33 = arith.select %30, %31, %32 : vector<8x1xi1>, vector<8x1xf32>
    %34 = arith.select %25, %29, %33 : vector<8x1xi1>, vector<8x1xf32>
    %c0_12 = arith.constant 0 : index
    %c3_13 = arith.constant 3 : index
    %35 = vector.load %arg3[%c0_12, %c3_13] : memref<8x4xf32, #tpu.memory_space<vmem>>, vector<8x1xf32>
    tpu.vector_store %arg3[%c0_12, %c3_13], %34 {strides = array<i32>} : memref<8x4xf32, #tpu.memory_space<vmem>>, vector<8x1xf32>,
    %36 = arith.negf %18 : vector<8x3xf32>
    %37 = math.exp %36 : vector<8x3xf32>
    %cst_14 = arith.constant 1.000000e+00 : f32
    %38 = vector.broadcast %cst_14 : f32 to vector<8x3xf32>
    %39 = arith.addf %38, %37 : vector<8x3xf32>
    %40 = arith.divf %38, %39 : vector<8x3xf32>
    %c0_15 = arith.constant 0 : index
    %c0_16 = arith.constant 0 : index
    %41 = vector.load %arg3[%c0_15, %c0_16] : memref<8x4xf32, #tpu.memory_space<vmem>>, vector<8x3xf32>
    tpu.vector_store %arg3[%c0_15, %c0_16], %40 {strides = array<i32>} : memref<8x4xf32, #tpu.memory_space<vmem>>, vector<8x3xf32>,
    return
  }
}

</mosaic_0001>

<bundles_post_ra>
// kernel: tree_forward.1
= control target key start
LH: loop header
LB: loop body
LE: loop exit
PB: predicated region body
PF: predicated region fallthrough
CT: control target
= control target key end

     0   :  { %8 = vsyncpa [#allocation3], 0  ;;  %s643_s0 = inlined_call_operand.vmem [shape: f32[8,16], index: 0, kind: input, shape index: {}]   ;;  %s644_s1 = inlined_call_operand.vmem [shape: f32[232,96], index: 1, kind: input, shape index: {}]   ;;  %s645_s2 = inlined_call_operand.vmem [shape: f32[4], index: 2, kind: input, shape index: {}]   ;;  %s646_s3 = inlined_call_operand.vmem [shape: f32[8,4], index: 3, kind: output, shape index: {}]  }
   0x1   :  { %s19_s14 = sshll.u32 %s645_s2, 4  ;;  %s20_s14 = int_to_ptr.vmem [resolvable:$true] %s19_s14 }
   0x2   :  { %s485_s15 = scalar_lea.vmem %s20_s14, 16  ;;  %p490_p1 = scmp.lt.s32.totalorder %s20_s14, %s20_s14 }
   0x3   :  { %p486_p0 = scmp.ne.s32.totalorder %s20_s14, %s485_s15  ;;  %p491_p2 = scmp.lt.s32.totalorder %s485_s15, %s485_s15 }
   0x5   :  { %p492_p3 = por %p491_p2, %p490_p1 }
   0x7   :  { %p493_p4 = pnand %p492_p3, %p486_p0 }
   0x9   :  { %496 = shalt.err (!%p493_p4)
}
   0xa   :  { %s499_s16 = smov [#allocation2]  }
   0xb   :  { %22 = dma.vmem_to_smem %s20_s14, 16, %s499_s16, [#allocation3]  }
   0xc   :  { %497 = dma.done.wait [#allocation3], 16  }
   0xd   :  { %498 = vsyncadd [#allocation3], 4294967280 }
   0xe   :  { %26 = sfence }
   0xf   :  { %v28_v0 = vld [vmem:[%s644_s1] sm:$0xff]  ;;  %v29_v1 = vld [vmem:[%s644_s1 + $0x8] sm:$0xff]  ;;  %v500_v2 = vmov 0.0|0.0   ;;  %vm501_vm0 = vmmov 0   ;;  %v502_v4 = vmov 0.0   ;;  %v31_v5 = vld [vmem:[%s644_s1 + $0x18] sm:$0xff] }
  0x10   :  { %431 = vmatprep.subr.bf16.mxu0 %v500_v2  ;;  %v432_v3 = vpack.c.bf16 %v29_v1, %v28_v0  ;;  %374 = vmatprep.mubr.msk.f32.mxu0 %vm501_vm0, %v502_v4  ;;  %v32_v6 = vld [vmem:[%s644_s1 + $0x20] sm:$0xff]  ;;  %v33_v7 = vld [vmem:[%s644_s1 + $0x28] sm:$0xff]  ;;  %v34_v9 = vld [vmem:[%s644_s1 + $0x30] sm:$0xff]  ;;  %vm61_vm1 = vcmask 130048   ;;  %vm140_vm2 = vcmask 785408   ;;  %s293_s17 = sld [smem:[#allocation2]] }
  0x11   :  { %434 = vmatprep.subr.bf16.mxu1 %v500_v2  ;;  %v435_v8 = vpack.c.bf16 %v32_v6, %v31_v5  ;;  %401 = vmatprep.mubr.msk.f32.mxu1 %vm501_vm0, %v502_v4  ;;  %v27_v10 = vld [vmem:[%s643_s0] sm:$0xff]  ;;  %v438_v11 = vpack.c.bf16 %v34_v9, %v33_v7  ;;  %v35_v12 = vld [vmem:[%s644_s1 + $0x38] sm:$0xff]  ;;  %v37_v15 = vld [vmem:[%s644_s1 + $0x48] sm:$0xff]  ;;  %s337_s18 = sld [smem:[#allocation2 + $0x1]]  ;;  %s338_s19 = sld [smem:[#allocation2 + $0x2]]  ;;  %vm316_vm4 = vcmask 31768  }
  0x12   :  { %433 = vmatpush3.bf16.msra.mxu0 %v432_v3  ;;  %v36_v13 = vld [vmem:[%s644_s1 + $0x40] sm:$0xff]  ;;  %v38_v16 = vld [vmem:[%s644_s1 + $0x50] sm:$0xff]  ;;  %v39_v18 = vld [vmem:[%s644_s1 + $0x58] sm:$0xff]  ;;  %s339_s20 = sld [smem:[#allocation2 + $0x3]]  ;;  %s503_s22 = smov 127   ;;  %vm324_vm5 = vcmask 23552  }
  0x13   :  { %436 = vmatpush3.bf16.msra.mxu1 %v435_v8  ;;  %452 = vmatprep.subr.bf16.mxu0 %v500_v2  ;;  %v441_v14 = vpack.c.bf16 %v36_v13, %v35_v12  ;;  %v444_v17 = vpack.c.bf16 %v38_v16, %v37_v15  ;;  %v40_v19 = vld [vmem:[%s644_s1 + $0x60] sm:$0xff]  ;;  %v41_v21 = vld [vmem:[%s644_s1 + $0x68] sm:$0xff]  ;;  %v42_v22 = vld [vmem:[%s644_s1 + $0x70] sm:$0xff]  ;;  %s504_s23 = smov 126   ;;  %s505_s24 = smov 3  }
  0x14   :  { %437 = vmatprep.subr.bf16.mxu1 %v500_v2  ;;  %v447_v20 = vpack.c.bf16 %v40_v19, %v39_v18  ;;  %v450_v23 = vpack.c.bf16 %v42_v22, %v41_v21  ;;  %v44_v24 = vld [vmem:[%s644_s1 + $0x80] sm:$0xff]  ;;  %v45_v25 = vld [vmem:[%s644_s1 + $0x88] sm:$0xff]  ;;  %v46_v26 = vld [vmem:[%s644_s1 + $0x90] sm:$0xff] }
  0x15   :  { %375 = vmatmul.mubr.msk.f32.vlgmr.msra.gmra.mrb[0].mxu0 %vm61_vm1, %v27_v10  ;;  %v453_v27 = vpack.c.bf16 %v45_v25, %v44_v24  ;;  %v47_v28 = vld [vmem:[%s644_s1 + $0x98] sm:$0xff]  ;;  %v48_v30 = vld [vmem:[%s644_s1 + $0xa0] sm:$0xff]  ;;  %v49_v31 = vld [vmem:[%s644_s1 + $0xa8] sm:$0xff] }
  0x16   :  { %428 = vmatprep.mubr.msk.f32.mxu0 %vm501_vm0, %v502_v4  ;;  %v456_v29 = vpack.c.bf16 %v47_v28, %v46_v26  ;;  %v459_v32 = vpack.c.bf16 %v49_v31, %v48_v30  ;;  %v331_v33 = vld [vmem:[%s644_s1 + $0x10] ss:$0 sm:$0xff]  ;;  %v51_v39 = vld [vmem:[%s644_s1 + $0xb8] sm:$0xff]  ;;  %v52_v41 = vld [vmem:[%s644_s1 + $0xc0] sm:$0xff]  ;;  %v297_v56 = vstv %s293_s17 }
  0x17   :  { %439 = vmatpush3.bf16.msra.mxu1 %v438_v11  ;;  %454 = vmatpush3.bf16.msra.mxu0 %v453_v27  ;;  %v50_v38 = vld [vmem:[%s644_s1 + $0xb0] sm:$0xff]  ;;  %v53_v42 = vld [vmem:[%s644_s1 + $0xc8] sm:$0xff]  ;;  %v55_v45 = vld [vmem:[%s644_s1 + $0xd8] sm:$0xff]  ;;  %v298_v57 = vstv %s337_s18 }
  0x18   :  { %440 = vmatprep.subr.bf16.mxu1 %v500_v2  ;;  %455 = vmatprep.subr.bf16.mxu0 %v500_v2  ;;  %v462_v40 = vpack.c.bf16 %v51_v39, %v50_v38  ;;  %v465_v43 = vpack.c.bf16 %v53_v42, %v52_v41  ;;  %v54_v44 = vld [vmem:[%s644_s1 + $0xd0] sm:$0xff]  ;;  %v333_v47 = vld [vmem:[%s644_s1 + $0x78] ss:$0 sm:$0xff]  ;;  %v335_v52 = vld [vmem:[%s644_s1 + $0xe0] ss:$0 sm:$0xff]  ;;  %v300_v59 = vstv %s338_s19 }
  0x19   :  { %v468_v46 = vpack.c.bf16 %v55_v45, %v54_v44  ;;  %v301_v60 = vstv %s339_s20 }
  0x1b   :  { %442 = vmatpush3.bf16.msra.mxu1 %v441_v14  ;;  %457 = vmatpush3.bf16.msra.mxu0 %v456_v29 }
  0x1c   :  { %443 = vmatprep.subr.bf16.mxu1 %v500_v2  ;;  %458 = vmatprep.subr.bf16.mxu0 %v500_v2 }
  0x1f   :  { %445 = vmatpush3.bf16.msra.mxu1 %v444_v17  ;;  %460 = vmatpush3.bf16.msra.mxu0 %v459_v32 }
  0x20   :  { %446 = vmatprep.subr.bf16.mxu1 %v500_v2  ;;  %461 = vmatprep.subr.bf16.mxu0 %v500_v2 }
  0x23   :  { %448 = vmatpush3.bf16.msra.mxu1 %v447_v20  ;;  %463 = vmatpush3.bf16.msra.mxu0 %v462_v40 }
  0x24   :  { %449 = vmatprep.subr.bf16.mxu1 %v500_v2  ;;  %464 = vmatprep.subr.bf16.mxu0 %v500_v2 }
  0x27   :  { %451 = vmatpush3.bf16.msra.mxu1 %v450_v23  ;;  %466 = vmatpush3.bf16.msra.mxu0 %v465_v43 }
  0x28   :  { %467 = vmatprep.subr.bf16.mxu0 %v500_v2 }
  0x2b   :  { %469 = vmatpush3.bf16.msra.mxu0 %v468_v46 }
  0xe8   :  { %v131_v34 = vpop.f32.mrb[0].mxu0 }
  0xe9   :  { %v132_v35 = vadd.f32 %v331_v33, %v131_v34  ;;  %v376_v36 = vpop.f32.mrb[1].mxu0 }
  0xeb   :  { %477 = vtanh.f32 %v132_v35 }
  0xf5   :  { %v478_v37 = vpop.eup %477 }
  0xf6   :  { %402 = vmatmul.mubr.msk.f32.vlgmr.msra.gmra.mrb[0].mxu1 %vm140_vm2, %v478_v37 }
 0x1c9   :  { %v210_v48 = vpop.f32.mrb[0].mxu1 }
 0x1ca   :  { %v211_v49 = vadd.f32 %v333_v47, %v210_v48  ;;  %v403_v50 = vpop.f32.mrb[1].mxu1 }
 0x1cc   :  { %479 = vtanh.f32 %v211_v49 }
 0x1d6   :  { %v480_v51 = vpop.eup %479 }
 0x1d7   :  { %429 = vmatmul.mubr.msk.f32.vlgmr.msra.gmra.mrb[2].mxu0 %vm140_vm2, %v480_v51 }
 0x2aa   :  { %v288_v53 = vpop.f32.mrb[2].mxu0 }
 0x2ab   :  { %v289_v54 = vadd.f32 %v335_v52, %v288_v53  ;;  %v430_v55 = vpop.f32.mrb[3].mxu0 }
 0x2ad   :  { %vm292_vm3 = vcmp.ge.f32.partialorder %v289_v54, 0.0  ;;  %v340_v1 = vmul.f32 -1.442695, %v289_v54 }
 0x2ae   :  { %v299_v58 = vsel %vm292_vm3, %v297_v56, %v298_v57  ;;  %v302_v61 = vsel %vm292_vm3, %v300_v59, %v301_v60 }
 0x2af   :  { %304 = vrot.lane.b32.xlu0 %v299_v58, %s503_s22  ;;  %481 = vpow2.f32 %v340_v1 }
 0x2b3   :  { %308 = vrot.lane.b32.xlu0 %v302_v61, %s504_s23 }
 0x2b9   :  { %v482_v2 = vpop.eup %481 }
 0x2ba   :  { %v321_v3 = vadd.f32 1.0, %v482_v2 }
 0x2bc   :  { %483 = vrcp.f32 %v321_v3 }
 0x2c6   :  { %v484_v5 = vpop.eup %483 }
 0x321   :  { %v305_v62 = vpop.permute.xlu0 %304 }
 0x325   :  { %v309_v63 = vpop.permute.xlu0 %308 }
 0x326   :  { %v311_v0 = vsel %vm292_vm3, %v305_v62, %v309_v63 }
 0x327   :  { %313 = vrot.lane.b32.xlu1 %v311_v0, %s505_s24 }
 0x399   :  { %v314_v4 = vpop.permute.xlu1 %313 }
 0x39a   :  { %317 = vst.msk [vmem:[%s646_s3] sm:$0xff] %vm316_vm4, %v314_v4 }
 0x39b   :  { %325 = vst.msk [vmem:[%s646_s3] sm:$0xff] %vm324_vm5, %v484_v5 }
 0x39c   :  { %330 = vsyncpa [#allocation3], 1 }

</bundles_post_ra>
